<compile_context>
chip_gen: v7x
topology: tpu7x:2x2x1
jax: 0.10.0
libtpu: 0.0.40
codegen_flags: <defaults>
</compile_context>

<pallas_src>
import numpy as np
import jax
import jax.numpy as jnp
from jax.experimental import pallas as pl
from jax.experimental.pallas import tpu as pltpu

EPS = 1e-5


def _build_taps():
    """T[i, j, (h+i)*10+(w+j), h*8+w] = 1 : maps flat 10x10 pixels to 8x8 conv taps."""
    t = np.zeros((3, 3, 100, 64), np.float32)
    hw = np.arange(64)
    h, w = hw // 8, hw % 8
    for i in range(3):
        for j in range(3):
            t[i, j, (h + i) * 10 + (w + j), hw] = 1.0
    return t


_TAPS = _build_taps()


# ------------------------- one-time parameter folding -------------------------

def prepare_params(params):
    """Fold eval-mode BatchNorm + conv bias, build the conv-as-matmul weight, and
    collapse Linear(32,8) @ Linear(8,1).  Run ONCE; outputs are reused every call."""
    scale = params["bn_gamma"] / jnp.sqrt(params["bn_rv"] + EPS)                   # (4,)
    conv_bias = (params["conv_b"] - params["bn_rm"]) * scale + params["bn_beta"]   # (4,)
    wc_s = params["conv_w"].reshape(4, 3, 3) * scale[:, None, None]                # (4,3,3)

    # Conv2d(1,4,k=3) on a 10x10 image as ONE dense matmul over flat pixels; output
    # comes out directly in the channel-major nn.Flatten order (c*64 + h*8 + w).
    # Pad K from 100 -> 128 with zero rows (exact: padded x columns hit zero rows).
    m = jnp.einsum("cij,ijpq->pcq", wc_s, jnp.asarray(_TAPS)).reshape(100, 256)    # (100,256)
    m_pad = jnp.pad(m, ((0, 28), (0, 0)))                                          # (128,256)
    cbias = jnp.repeat(conv_bias, 64)[None, :]                                     # (1,256)

    w1 = params["w1"]                                                              # (256,32)
    b1 = params["b1"][None, :]                                                     # (1,32)

    # Linear(32,8) followed by Linear(8,1) with no nonlinearity between -> one row.
    w23 = (params["w2"] @ params["w3"]).reshape(1, 32)                             # (1,32)
    b23 = (params["b2"] @ params["w3"] + params["b3"]).reshape(1, 1)               # (1,1)

    return (m_pad, cbias, w1, b1, w23, b23)


# ------------------------------- fused kernel --------------------------------

def fused_kernel(x1_ref, x2_ref, m_ref, cb_ref, w1_ref, b1_ref, w23_ref, b23_ref, o_ref):
    """x1_ref/x2_ref  : (B,128)   flattened 10x10 towers, zero-padded to K=128
       m_ref          : (128,256) conv-as-matmul weight (BN scale folded, zero pad rows)
       cb_ref         : (1,256)   folded conv+BN per-channel bias (channel-major)
       w1_ref/b1_ref  : (256,32) / (1,32)  fc Linear(256,32)
       w23_ref/b23_ref: (1,32)   / (1,1)   collapsed Linear(32,8)+Linear(8,1)
       o_ref          : (B,1)     final Siamese score
    """
    m = m_ref[...]
    cb = cb_ref[...]
    # Conv + BN + ReLU for both towers: two small MXU passes sharing the resident RHS.
    e1 = jnp.maximum(jnp.dot(x1_ref[...], m, preferred_element_type=jnp.float32) + cb, 0.0)
    e2 = jnp.maximum(jnp.dot(x2_ref[...], m, preferred_element_type=jnp.float32) + cb, 0.0)
    d = jnp.abs(e1 - e2)                                                       # (B,256)

    h = jnp.dot(d, w1_ref[...], preferred_element_type=jnp.float32) + b1_ref[...]
    h = jnp.maximum(h, 0.0)                                                    # (B,32)
    # TODO(synk): nn.Dropout(0.3) is identity in eval mode; training-mode masking not implemented.

    # Final (B,32)@(32,1) as VPU broadcast-multiply + lane reduction (no N=1 MXU pass).
    o_ref[...] = jnp.sum(h * w23_ref[...], axis=-1, keepdims=True) + b23_ref[...]


# ------------------------------ glue / wrapper -------------------------------

_VMEM = pl.BlockSpec(memory_space=pltpu.MemorySpace.VMEM)   # whole-array block in VMEM


@jax.jit
def siamese_forward(folded, x1, x2):
    m_pad, cbias, w1, b1, w23, b23 = folded
    B = x1.shape[0]
    # Flatten and zero-pad each tower to K=128 (padded columns hit zero rows of m_pad).
    x1f = jnp.pad(x1.reshape(B, 100).astype(jnp.float32), ((0, 0), (0, 28)))
    x2f = jnp.pad(x2.reshape(B, 100).astype(jnp.float32), ((0, 0), (0, 28)))

    flops = 2 * (2 * B * 128 * 256 + B * 256 * 32 + B * 32)
    bytes_accessed = 4 * (2 * B * 128 + 128 * 256 + 256 + 256 * 32 + 32 + 32 + 1 + B)

    return pl.pallas_call(
        fused_kernel,
        out_shape=jax.ShapeDtypeStruct((B, 1), jnp.float32),
        in_specs=[_VMEM] * 8,
        out_specs=_VMEM,
        cost_estimate=pl.CostEstimate(
            flops=flops, transcendentals=0, bytes_accessed=bytes_accessed),
    )(x1f, x2f, m_pad, cbias, w1, b1, w23, b23)


# --------------------------- reference (plain JAX) ---------------------------

def reference_forward(params, x1, x2):
    def embed(x):
        y = jax.lax.conv_general_dilated(
            x, params["conv_w"], window_strides=(1, 1), padding="VALID",
            dimension_numbers=("NCHW", "OIHW", "NCHW"))
        y = y + params["conv_b"].reshape(1, 4, 1, 1)
        y = (y - params["bn_rm"].reshape(1, 4, 1, 1)) / jnp.sqrt(
            params["bn_rv"].reshape(1, 4, 1, 1) + EPS)
        y = y * params["bn_gamma"].reshape(1, 4, 1, 1) + params["bn_beta"].reshape(1, 4, 1, 1)
        y = jnp.maximum(y, 0.0)
        return y.reshape(y.shape[0], -1)          # (B, 256), channel-major flatten

    e1, e2 = embed(x1), embed(x2)
    d = jnp.abs(e1 - e2)
    h = jnp.maximum(d @ params["w1"] + params["b1"], 0.0)
    h = h @ params["w2"] + params["b2"]
    return h @ params["w3"] + params["b3"]


# ------------------------------ parameter init -------------------------------

def init_params(key):
    ks = jax.random.split(key, 12)
    return {
        "conv_w":   0.30 * jax.random.normal(ks[0], (4, 1, 3, 3), jnp.float32),
        "conv_b":   0.10 * jax.random.normal(ks[1], (4,), jnp.float32),
        "bn_gamma": 1.0 + 0.10 * jax.random.normal(ks[2], (4,), jnp.float32),
        "bn_beta":  0.10 * jax.random.normal(ks[3], (4,), jnp.float32),
        "bn_rm":    0.10 * jax.random.normal(ks[4], (4,), jnp.float32),
        "bn_rv":    jax.random.uniform(ks[5], (4,), jnp.float32, 0.5, 1.5),
        "w1":       0.06 * jax.random.normal(ks[6], (256, 32), jnp.float32),
        "b1":       0.10 * jax.random.normal(ks[7], (32,), jnp.float32),
        "w2":       0.17 * jax.random.normal(ks[8], (32, 8), jnp.float32),
        "b2":       0.10 * jax.random.normal(ks[9], (8,), jnp.float32),
        "w3":       0.35 * jax.random.normal(ks[10], (8, 1), jnp.float32),
        "b3":       0.10 * jax.random.normal(ks[11], (1,), jnp.float32),
    }


if __name__ == "__main__":
    key = jax.random.PRNGKey(0)
    kp, k1, k2 = jax.random.split(key, 3)
    params = init_params(kp)
    folded = prepare_params(params)   # one-time folding, hoisted out of the per-call path

    B = 8                             # keep batch a multiple of 8 (sublane-tile aligned)
    x1 = jax.random.normal(k1, (B, 1, 10, 10), jnp.float32)
    x2 = jax.random.normal(k2, (B, 1, 10, 10), jnp.float32)

    out = jax.block_until_ready(siamese_forward(folded, x1, x2))
    ref = reference_forward(params, x1, x2)

    assert out.shape == (B, 1), out.shape
    max_err = float(jnp.max(jnp.abs(out - ref)))
    if max_err > 1e-4:
        raise SystemExit(f"MISMATCH: max abs err = {max_err}")
    print("KERNEL_OK")
</pallas_src>

<mosaic_0001>
module attributes {stable_mosaic.version = 11 : i64} {
  func.func @fused_kernel(%arg0: memref<8x128xf32, #tpu.memory_space<vmem>>, %arg1: memref<8x128xf32, #tpu.memory_space<vmem>>, %arg2: memref<128x256xf32, #tpu.memory_space<vmem>>, %arg3: memref<1x256xf32, #tpu.memory_space<vmem>>, %arg4: memref<256x32xf32, #tpu.memory_space<vmem>>, %arg5: memref<1x32xf32, #tpu.memory_space<vmem>>, %arg6: memref<1x32xf32, #tpu.memory_space<vmem>>, %arg7: memref<1x1xf32, #tpu.memory_space<vmem>>, %arg8: memref<8x1xf32, #tpu.memory_space<vmem>>) attributes {dimension_semantics = [], scalar_prefetch = 0 : i64, scratch_operands = 0 : i64, tpu.core_type = #tpu.core_type<tc>} {
    %c0 = arith.constant 0 : index
    %c0_0 = arith.constant 0 : index
    %0 = vector.load %arg2[%c0, %c0_0] : memref<128x256xf32, #tpu.memory_space<vmem>>, vector<128x256xf32>
    %c0_1 = arith.constant 0 : index
    %c0_2 = arith.constant 0 : index
    %1 = vector.load %arg3[%c0_1, %c0_2] : memref<1x256xf32, #tpu.memory_space<vmem>>, vector<1x256xf32>
    %c0_3 = arith.constant 0 : index
    %c0_4 = arith.constant 0 : index
    %2 = vector.load %arg0[%c0_3, %c0_4] : memref<8x128xf32, #tpu.memory_space<vmem>>, vector<8x128xf32>
    %cst = arith.constant dense<0.000000e+00> : vector<8x256xf32>
    %3 = tpu.matmul %2, %0, %cst {dimension_numbers = #tpu.dot_dimension_numbers<[1], [0], [0], [1], [0, 0, 1, 1], [], []>} : vector<8x128xf32>, vector<128x256xf32>, vector<8x256xf32> -> vector<8x256xf32>
    %4 = vector.broadcast %1 : vector<1x256xf32> to vector<8x256xf32>
    %5 = arith.addf %3, %4 : vector<8x256xf32>
    %cst_5 = arith.constant 0.000000e+00 : f32
    %6 = vector.broadcast %cst_5 : f32 to vector<8x256xf32>
    %7 = arith.maximumf %5, %6 : vector<8x256xf32>
    %c0_6 = arith.constant 0 : index
    %c0_7 = arith.constant 0 : index
    %8 = vector.load %arg1[%c0_6, %c0_7] : memref<8x128xf32, #tpu.memory_space<vmem>>, vector<8x128xf32>
    %cst_8 = arith.constant dense<0.000000e+00> : vector<8x256xf32>
    %9 = tpu.matmul %8, %0, %cst_8 {dimension_numbers = #tpu.dot_dimension_numbers<[1], [0], [0], [1], [0, 0, 1, 1], [], []>} : vector<8x128xf32>, vector<128x256xf32>, vector<8x256xf32> -> vector<8x256xf32>
    %10 = vector.broadcast %1 : vector<1x256xf32> to vector<8x256xf32>
    %11 = arith.addf %9, %10 : vector<8x256xf32>
    %cst_9 = arith.constant 0.000000e+00 : f32
    %12 = vector.broadcast %cst_9 : f32 to vector<8x256xf32>
    %13 = arith.maximumf %11, %12 : vector<8x256xf32>
    %14 = arith.subf %7, %13 : vector<8x256xf32>
    %15 = math.absf %14 : vector<8x256xf32>
    %c0_10 = arith.constant 0 : index
    %c0_11 = arith.constant 0 : index
    %16 = vector.load %arg4[%c0_10, %c0_11] : memref<256x32xf32, #tpu.memory_space<vmem>>, vector<256x32xf32>
    %cst_12 = arith.constant dense<0.000000e+00> : vector<8x32xf32>
    %17 = tpu.matmul %15, %16, %cst_12 {dimension_numbers = #tpu.dot_dimension_numbers<[1], [0], [0], [1], [0, 0, 1, 1], [], []>} : vector<8x256xf32>, vector<256x32xf32>, vector<8x32xf32> -> vector<8x32xf32>
    %c0_13 = arith.constant 0 : index
    %c0_14 = arith.constant 0 : index
    %18 = vector.load %arg5[%c0_13, %c0_14] : memref<1x32xf32, #tpu.memory_space<vmem>>, vector<1x32xf32>
    %19 = vector.broadcast %18 : vector<1x32xf32> to vector<8x32xf32>
    %20 = arith.addf %17, %19 : vector<8x32xf32>
    %cst_15 = arith.constant 0.000000e+00 : f32
    %21 = vector.broadcast %cst_15 : f32 to vector<8x32xf32>
    %22 = arith.maximumf %20, %21 : vector<8x32xf32>
    %c0_16 = arith.constant 0 : index
    %c0_17 = arith.constant 0 : index
    %23 = vector.load %arg6[%c0_16, %c0_17] : memref<1x32xf32, #tpu.memory_space<vmem>>, vector<1x32xf32>
    %24 = vector.broadcast %23 : vector<1x32xf32> to vector<8x32xf32>
    %25 = arith.mulf %22, %24 : vector<8x32xf32>
    %cst_18 = arith.constant dense<0.000000e+00> : vector<8xf32>
    %26 = vector.multi_reduction <add>, %25, %cst_18 [1] : vector<8x32xf32> to vector<8xf32>
    %27 = vector.shape_cast %26 : vector<8xf32> to vector<8x1xf32>
    %c0_19 = arith.constant 0 : index
    %c0_20 = arith.constant 0 : index
    %28 = vector.load %arg7[%c0_19, %c0_20] : memref<1x1xf32, #tpu.memory_space<vmem>>, vector<1x1xf32>
    %29 = vector.broadcast %28 : vector<1x1xf32> to vector<8x1xf32>
    %30 = arith.addf %27, %29 : vector<8x1xf32>
    %c0_21 = arith.constant 0 : index
    %c0_22 = arith.constant 0 : index
    %31 = vector.load %arg8[%c0_21, %c0_22] : memref<8x1xf32, #tpu.memory_space<vmem>>, vector<8x1xf32>
    tpu.vector_store %arg8[%c0_21, %c0_22], %30 {strides = array<i32>} : memref<8x1xf32, #tpu.memory_space<vmem>>, vector<8x1xf32>,
    return
  }
}

</mosaic_0001>

<bundles_post_ra>
// kernel: siamese_forward.1
= control target key start
LH: loop header
LB: loop body
LE: loop exit
PB: predicated region body
PF: predicated region fallthrough
CT: control target
= control target key end

     0   :  { %v498_v3 = vmov 0.0   ;;  %vm345_vm0 = vcmask 261120   ;;  %vm357_vm1 = vcmask 7168   ;;  %s757_s2 = inlined_call_operand.vmem [shape: f32[128,256], index: 2, kind: input, shape index: {}]   ;;  %s758_s4 = inlined_call_operand.vmem [shape: f32[256,32], index: 4, kind: input, shape index: {}]   ;;  %s759_s0 = inlined_call_operand.vmem [shape: f32[8,128], index: 0, kind: input, shape index: {}]   ;;  %s760_s1 = inlined_call_operand.vmem [shape: f32[8,128], index: 1, kind: input, shape index: {}]   ;;  %s761_s3 = inlined_call_operand.vmem [shape: f32[1,256], index: 3, kind: input, shape index: {}]   ;;  %s762_s7 = inlined_call_operand.<no memory space> [shape: f32[1,1], index: 7, kind: input, shape index: {}]   ;;  %s763_s5 = inlined_call_operand.vmem [shape: f32[1,32], index: 5, kind: input, shape index: {}]   ;;  %s764_s6 = inlined_call_operand.vmem [shape: f32[1,32], index: 6, kind: input, shape index: {}]   ;;  %s765_s8 = inlined_call_operand.vmem [shape: f32[8,1], index: 8, kind: output, shape index: {}]  }
   0x1   :  { %v32_v0 = vld [vmem:[%s757_s2 + $0x8] sm:$0xff]  ;;  %v34_v1 = vld [vmem:[%s757_s2 + $0x18] sm:$0xff]  ;;  %v31_v2 = vld [vmem:[%s757_s2] sm:$0xff]  ;;  %140 = vmatprep.mubr.f32.mxu0 %v498_v3  ;;  %214 = vmatprep.mubr.f32.mxu1 %v498_v3 }
   0x2   :  { %v401_v4 = vpack.c.bf16 %v34_v1, %v32_v0  ;;  %v33_v5 = vld [vmem:[%s757_s2 + $0x10] sm:$0xff]  ;;  %v36_v6 = vld [vmem:[%s757_s2 + $0x28] sm:$0xff]  ;;  %v38_v7 = vld [vmem:[%s757_s2 + $0x38] sm:$0xff] }
   0x3   :  { %v403_v8 = vpack.c.bf16 %v33_v5, %v31_v2  ;;  %v405_v9 = vpack.c.bf16 %v38_v7, %v36_v6  ;;  %v35_v10 = vld [vmem:[%s757_s2 + $0x20] sm:$0xff]  ;;  %v37_v11 = vld [vmem:[%s757_s2 + $0x30] sm:$0xff]  ;;  %v40_v12 = vld [vmem:[%s757_s2 + $0x48] sm:$0xff] }
   0x4   :  { %402 = vmatprep.subr.bf16.mxu0 %v401_v4  ;;  %434 = vmatprep.subr.bf16.mxu1 %v401_v4  ;;  %v42_v13 = vld [vmem:[%s757_s2 + $0x58] sm:$0xff]  ;;  %v407_v14 = vpack.c.bf16 %v37_v11, %v35_v10  ;;  %v39_v16 = vld [vmem:[%s757_s2 + $0x40] sm:$0xff]  ;;  %v41_v17 = vld [vmem:[%s757_s2 + $0x50] sm:$0xff] }
   0x5   :  { %404 = vmatpush1.bf16.msra.mxu0 %v403_v8  ;;  %436 = vmatpush1.bf16.msra.mxu1 %v403_v8  ;;  %v409_v15 = vpack.c.bf16 %v42_v13, %v40_v12  ;;  %v44_v18 = vld [vmem:[%s757_s2 + $0x68] sm:$0xff]  ;;  %v46_v19 = vld [vmem:[%s757_s2 + $0x78] sm:$0xff]  ;;  %v411_v20 = vpack.c.bf16 %v41_v17, %v39_v16  ;;  %v43_v22 = vld [vmem:[%s757_s2 + $0x60] sm:$0xff] }
   0x6   :  { %406 = vmatprep.subr.bf16.mxu0 %v405_v9  ;;  %438 = vmatprep.subr.bf16.mxu1 %v405_v9  ;;  %v413_v21 = vpack.c.bf16 %v46_v19, %v44_v18  ;;  %v45_v23 = vld [vmem:[%s757_s2 + $0x70] sm:$0xff]  ;;  %v48_v24 = vld [vmem:[%s757_s2 + $0x88] sm:$0xff]  ;;  %v50_v25 = vld [vmem:[%s757_s2 + $0x98] sm:$0xff] }
   0x7   :  { %v415_v26 = vpack.c.bf16 %v45_v23, %v43_v22  ;;  %v417_v27 = vpack.c.bf16 %v50_v25, %v48_v24  ;;  %v47_v28 = vld [vmem:[%s757_s2 + $0x80] sm:$0xff]  ;;  %v49_v29 = vld [vmem:[%s757_s2 + $0x90] sm:$0xff]  ;;  %v52_v30 = vld [vmem:[%s757_s2 + $0xa8] sm:$0xff] }
   0x8   :  { %v54_v31 = vld [vmem:[%s757_s2 + $0xb8] sm:$0xff]  ;;  %v419_v32 = vpack.c.bf16 %v49_v29, %v47_v28  ;;  %v51_v34 = vld [vmem:[%s757_s2 + $0xa0] sm:$0xff]  ;;  %v53_v35 = vld [vmem:[%s757_s2 + $0xb0] sm:$0xff] }
   0x9   :  { %408 = vmatpush1.bf16.msra.mxu0 %v407_v14  ;;  %440 = vmatpush1.bf16.msra.mxu1 %v407_v14  ;;  %v421_v33 = vpack.c.bf16 %v54_v31, %v52_v30  ;;  %v56_v36 = vld [vmem:[%s757_s2 + $0xc8] sm:$0xff]  ;;  %v58_v37 = vld [vmem:[%s757_s2 + $0xd8] sm:$0xff]  ;;  %v423_v38 = vpack.c.bf16 %v53_v35, %v51_v34  ;;  %v55_v40 = vld [vmem:[%s757_s2 + $0xc0] sm:$0xff]  ;;  %v66_v35 = vlaneseq }
   0xa   :  { %410 = vmatprep.subr.bf16.mxu0 %v409_v15  ;;  %442 = vmatprep.subr.bf16.mxu1 %v409_v15  ;;  %v425_v39 = vpack.c.bf16 %v58_v37, %v56_v36  ;;  %v57_v41 = vld [vmem:[%s757_s2 + $0xd0] sm:$0xff]  ;;  %v60_v42 = vld [vmem:[%s757_s2 + $0xe8] sm:$0xff]  ;;  %v62_v43 = vld [vmem:[%s757_s2 + $0xf8] sm:$0xff] }
   0xb   :  { %v427_v44 = vpack.c.bf16 %v57_v41, %v55_v40  ;;  %v429_v45 = vpack.c.bf16 %v62_v43, %v60_v42  ;;  %v59_v46 = vld [vmem:[%s757_s2 + $0xe0] sm:$0xff]  ;;  %v61_v47 = vld [vmem:[%s757_s2 + $0xf0] sm:$0xff]  ;;  %v244_v49 = vld [vmem:[%s758_s4 + $0x88] sm:$0xff]  ;;  %v67_v36 = vshrl.u32 %v66_v35, 7 }
   0xc   :  { %v243_v48 = vld [vmem:[%s758_s4 + $0x80] sm:$0xff]  ;;  %v431_v50 = vpack.c.bf16 %v61_v47, %v59_v46  ;;  %v228_v53 = vld [vmem:[%s758_s4 + $0x8] sm:$0xff]  ;;  %v245_v54 = vld [vmem:[%s758_s4 + $0x90] sm:$0xff] }
   0xd   :  { %412 = vmatpush1.bf16.msra.mxu0 %v411_v20  ;;  %444 = vmatpush1.bf16.msra.mxu1 %v411_v20  ;;  %v465_v51 = vpack.c.bf16 %v244_v49, %v243_v48  ;;  %v227_v52 = vld [vmem:[%s758_s4] sm:$0xff]  ;;  %v246_v55 = vld [vmem:[%s758_s4 + $0x98] sm:$0xff]  ;;  %v229_v60 = vld [vmem:[%s758_s4 + $0x10] sm:$0xff]  ;;  %v68_v37 = vsub.s32 0, %v67_v36 }
   0xe   :  { %414 = vmatprep.subr.bf16.mxu0 %v413_v21  ;;  %446 = vmatprep.subr.bf16.mxu1 %v413_v21  ;;  %v64_v56 = vld [vmem:[%s759_s0] sm:$0xff]  ;;  %v467_v58 = vpack.c.bf16 %v228_v53, %v227_v52  ;;  %v469_v59 = vpack.c.bf16 %v246_v55, %v245_v54  ;;  %v230_v61 = vld [vmem:[%s758_s4 + $0x18] sm:$0xff]  ;;  %v248_v63 = vld [vmem:[%s758_s4 + $0xa8] sm:$0xff] }
   0xf   :  { %v149_v57 = vld [vmem:[%s760_s1] sm:$0xff]  ;;  %v471_v0 = vpack.c.bf16 %v230_v61, %v229_v60  ;;  %v232_v3 = vld [vmem:[%s758_s4 + $0x28] sm:$0xff]  ;;  %v249_v4 = vld [vmem:[%s758_s4 + $0xb0] sm:$0xff] }
  0x10   :  { %v247_v62 = vld [vmem:[%s758_s4 + $0xa0] sm:$0xff]  ;;  %v250_v5 = vld [vmem:[%s758_s4 + $0xb8] sm:$0xff]  ;;  %v233_v8 = vld [vmem:[%s758_s4 + $0x30] sm:$0xff] }
  0x11   :  { %416 = vmatpush1.bf16.msra.mxu0 %v415_v26  ;;  %448 = vmatpush1.bf16.msra.mxu1 %v415_v26  ;;  %v473_v1 = vpack.c.bf16 %v248_v63, %v247_v62  ;;  %v231_v2 = vld [vmem:[%s758_s4 + $0x20] sm:$0xff]  ;;  %v477_v7 = vpack.c.bf16 %v250_v5, %v249_v4  ;;  %v234_v9 = vld [vmem:[%s758_s4 + $0x38] sm:$0xff]  ;;  %v252_v11 = vld [vmem:[%s758_s4 + $0xc8] sm:$0xff] }
  0x12   :  { %418 = vmatprep.subr.bf16.mxu0 %v417_v27  ;;  %450 = vmatprep.subr.bf16.mxu1 %v417_v27  ;;  %v475_v6 = vpack.c.bf16 %v232_v3, %v231_v2  ;;  %v251_v10 = vld [vmem:[%s758_s4 + $0xc0] sm:$0xff]  ;;  %v479_v12 = vpack.c.bf16 %v234_v9, %v233_v8  ;;  %v236_v15 = vld [vmem:[%s758_s4 + $0x48] sm:$0xff]  ;;  %v253_v16 = vld [vmem:[%s758_s4 + $0xd0] sm:$0xff] }
  0x13   :  { %v481_v13 = vpack.c.bf16 %v252_v11, %v251_v10  ;;  %v235_v14 = vld [vmem:[%s758_s4 + $0x40] sm:$0xff]  ;;  %v254_v17 = vld [vmem:[%s758_s4 + $0xd8] sm:$0xff]  ;;  %v237_v20 = vld [vmem:[%s758_s4 + $0x50] sm:$0xff] }
  0x14   :  { %v483_v18 = vpack.c.bf16 %v236_v15, %v235_v14  ;;  %v485_v19 = vpack.c.bf16 %v254_v17, %v253_v16  ;;  %v238_v21 = vld [vmem:[%s758_s4 + $0x58] sm:$0xff]  ;;  %v255_v23 = vld [vmem:[%s758_s4 + $0xe0] sm:$0xff]  ;;  %v256_v24 = vld [vmem:[%s758_s4 + $0xe8] sm:$0xff] }
  0x15   :  { %420 = vmatpush1.bf16.msra.mxu0 %v419_v32  ;;  %452 = vmatpush1.bf16.msra.mxu1 %v419_v32  ;;  %v487_v22 = vpack.c.bf16 %v238_v21, %v237_v20  ;;  %v489_v25 = vpack.c.bf16 %v256_v24, %v255_v23  ;;  %v239_v26 = vld [vmem:[%s758_s4 + $0x60] sm:$0xff]  ;;  %v240_v27 = vld [vmem:[%s758_s4 + $0x68] sm:$0xff]  ;;  %v257_v29 = vld [vmem:[%s758_s4 + $0xf0] sm:$0xff] }
  0x16   :  { %422 = vmatprep.subr.bf16.mxu0 %v421_v33  ;;  %454 = vmatprep.subr.bf16.mxu1 %v421_v33  ;;  %v491_v28 = vpack.c.bf16 %v240_v27, %v239_v26  ;;  %v258_v30 = vld [vmem:[%s758_s4 + $0xf8] sm:$0xff]  ;;  %v241_v32 = vld [vmem:[%s758_s4 + $0x70] sm:$0xff]  ;;  %v363_v60 = vld [vmem:[%s763_s5] ss:$0 sm:$0xff] }
  0x17   :  { %v493_v31 = vpack.c.bf16 %v258_v30, %v257_v29  ;;  %v242_v33 = vld [vmem:[%s758_s4 + $0x78] sm:$0xff] }
  0x18   :  { %v495_v34 = vpack.c.bf16 %v242_v33, %v241_v32 }
  0x19   :  { %424 = vmatpush1.bf16.msra.mxu0 %v423_v38  ;;  %456 = vmatpush1.bf16.msra.mxu1 %v423_v38  ;;  %v63_v38 = vld [vmem:[%s761_s3] sm:$0x3] }
  0x1a   :  { %426 = vmatprep.subr.bf16.mxu0 %v425_v39  ;;  %458 = vmatprep.subr.bf16.mxu1 %v425_v39  ;;  %v72_v39 = vsub.s32 1, %v67_v36  ;;  %v69_v40 = vrot.slane %v63_v38, %v68_v37 }
  0x1c   :  { %v73_v41 = vrot.slane %v63_v38, %v72_v39 }
  0x1d   :  { %428 = vmatpush1.bf16.msra.mxu0 %v427_v44  ;;  %460 = vmatpush1.bf16.msra.mxu1 %v427_v44 }
  0x1e   :  { %430 = vmatprep.subr.bf16.mxu0 %v429_v45  ;;  %462 = vmatprep.subr.bf16.mxu1 %v429_v45 }
  0x21   :  { %432 = vmatpush1.bf16.msra.mxu0 %v431_v50  ;;  %464 = vmatpush1.bf16.msra.mxu1 %v431_v50 }
  0x22   :  { %466 = vmatprep.subr.bf16.mxu0 %v465_v51 }
  0x24   :  { %141 = vmatmul.mubr.f32.vlgmr.msra.gmra.mrb[0].mxu0 %v64_v56  ;;  %215 = vmatmul.mubr.f32.vlgmr.msra.gmra.mrb[0].mxu1 %v149_v57 }
  0x25   :  { %468 = vmatpush3.bf16.msra.mxu0 %v467_v58  ;;  %v13_v58 = vstv %s762_s7 }
  0x26   :  { %470 = vmatprep.subr.bf16.mxu0 %v469_v59  ;;  %14 = vst [vmem:[#allocation2] sm:$0x1] %v13_v58 }
  0x29   :  { %472 = vmatpush3.bf16.msra.mxu0 %v471_v0  ;;  %v364_v0 = vld [vmem:[%s764_s6] ss:$0 sm:$0xff] }
  0x2a   :  { %474 = vmatprep.subr.bf16.mxu0 %v473_v1 }
  0x2d   :  { %476 = vmatpush3.bf16.msra.mxu0 %v475_v6  ;;  %v365_v4 = vld [vmem:[#allocation2] ss:$0 sm:$0xff] }
  0x2e   :  { %478 = vmatprep.subr.bf16.mxu0 %v477_v7 }
  0x31   :  { %480 = vmatpush3.bf16.msra.mxu0 %v479_v12 }
  0x32   :  { %482 = vmatprep.subr.bf16.mxu0 %v481_v13 }
  0x35   :  { %484 = vmatpush3.bf16.msra.mxu0 %v483_v18 }
  0x36   :  { %486 = vmatprep.subr.bf16.mxu0 %v485_v19 }
  0x39   :  { %488 = vmatpush3.bf16.msra.mxu0 %v487_v22 }
  0x3a   :  { %490 = vmatprep.subr.bf16.mxu0 %v489_v25 }
  0x3d   :  { %492 = vmatpush3.bf16.msra.mxu0 %v491_v28 }
  0x3e   :  { %494 = vmatprep.subr.bf16.mxu0 %v493_v31 }
  0x41   :  { %496 = vmatpush3.bf16.msra.mxu0 %v495_v34 }
  0xf7   :  { %v142_v42 = vpop.f32.mrb[0].mxu0  ;;  %v216_v43 = vpop.f32.mrb[0].mxu1 }
  0xf8   :  { %v143_v44 = vadd.f32 %v142_v42, %v69_v40  ;;  %v217_v45 = vadd.f32 %v216_v43, %v69_v40  ;;  %v144_v46 = vpop.f32.mrb[1].mxu0  ;;  %v218_v47 = vpop.f32.mrb[1].mxu1 }
  0xf9   :  { %v145_v48 = vadd.f32 %v144_v46, %v73_v41  ;;  %v219_v49 = vadd.f32 %v218_v47, %v73_v41 }
  0xfa   :  { %v147_v50 = vmax.f32 %v143_v44, 0.0  ;;  %v221_v51 = vmax.f32 %v217_v45, 0.0 }
  0xfb   :  { %v148_v52 = vmax.f32 %v145_v48, 0.0  ;;  %v222_v53 = vmax.f32 %v219_v49, 0.0 }
  0xfc   :  { %v223_v54 = vsub.f32 %v147_v50, %v221_v51 }
  0xfd   :  { %v224_v55 = vsub.f32 %v148_v52, %v222_v53 }
  0xfe   :  { %v225_v57 = vand.u32 2147483647, %v223_v54 }
  0xff   :  { %v226_v56 = vand.u32 2147483647, %v224_v55 }
 0x101   :  { %330 = vmatprep.mubr.f32.mxu0 %v226_v56 }
 0x102   :  { %331 = vmatmul.mubr.f32.vlgmr.msra.gmra.mrb[2].mxu0 %v225_v57 }
 0x1d5   :  { %v398_v59 = vpop.f32.mrb[2].mxu0 }
 0x1d6   :  { %v399_v61 = vpop.f32.mrb[3].mxu0 }
 0x1d7   :  { %v400_v62 = vadd.f32 %v399_v61, %v398_v59 }
 0x1d9   :  { %v333_v63 = vadd.f32 %v400_v62, %v363_v60 }
 0x1db   :  { %v336_v1 = vmax.f32 %v333_v63, 0.0 }
 0x1dd   :  { %v344_v2 = vmul.f32 %v364_v0, %v336_v1 }
 0x1df   :  { %v346_v3 = vsel %vm345_vm0, %v344_v2, 0.0 }
 0x1e0   :  { %347 = vadd.xlane.f32.xlu0 %v346_v3 }
 0x26d   :  { %v348_v5 = vpop.xlane.xlu0 %347 }
 0x26e   :  { %v356_v6 = vadd.f32 %v365_v4, %v348_v5 }
 0x270   :  { %358 = vst.msk [vmem:[%s765_s8] sm:$0xff] %vm357_vm1, %v356_v6 }

</bundles_post_ra>
